<compile_context>
chip_gen: v5e
topology: v5e:2x2
jax: 0.10.0
libtpu: 0.0.40
codegen_flags: <defaults>
</compile_context>

<pallas_src>
import functools

import jax
import jax.numpy as jnp
from jax import lax
from jax.experimental import pallas as pl
from jax.experimental.pallas import tpu as pltpu


def _pono_kernel(x_ref, g_ref, b_ref, y_ref, m_ref, s_ref, *, eps, inv_cm1):
    # x_ref: (Nb, C, T)   g_ref/b_ref: (1, 1, T)
    x = x_ref[...].astype(jnp.float32)

    # Mean over the channel dim.
    mean = jnp.mean(x, axis=1, keepdims=True)                   # (Nb, 1, T)
    diff = x - mean

    # Unbiased variance (PyTorch x.var default divides by C-1); C==1 -> NaN,
    # matching torch.
    var_eps = jnp.sum(diff * diff, axis=1, keepdims=True) * jnp.float32(
        inv_cm1
    ) + jnp.float32(eps)

    inv_std = lax.rsqrt(var_eps)     # EUP; feeds the normalized output
    std = jnp.sqrt(var_eps)          # EUP; exact value for the stats output

    # Fused affine: single per-position scale/shift broadcast over C.
    scale = inv_std * g_ref[...].astype(jnp.float32)            # (Nb, 1, T)
    y = diff * scale + b_ref[...].astype(jnp.float32)           # (Nb, C, T)

    y_ref[...] = y.astype(y_ref.dtype)
    m_ref[...] = mean.astype(m_ref.dtype)
    s_ref[...] = std.astype(s_ref.dtype)


def _round_up(v, m):
    return -(-v // m) * m


def _round_down(v, m):
    return (v // m) * m


def _select_tiles(n, c, hw, dsize, vmem_budget):
    """Pick (batch block Nb, lane tile T). T is a multiple of 128 (or == hw)."""
    # Batch-block tiny channel counts so vreg sublanes get filled.
    pack = 8 if dsize >= 4 else 16
    nb = min(n, pl.cdiv(pack, c)) if c < pack else 1

    if hw <= 128:
        return nb, hw  # full last dim is always a legal block

    hw_pad = _round_up(hw, 128)

    # Lane tile targeting ~2 MiB of f32 working data per x block.
    target_bytes = 2 * 1024 * 1024
    t = target_bytes // max(1, nb * c * 4)
    t = max(128, min(_round_down(t, 128), hw_pad, 32 * 1024))

    def footprint(nb_, t_):
        x_blk = nb_ * c * t_ * dsize
        y_blk = nb_ * c * t_ * dsize
        small = (2 + 2 * nb_) * t_ * dsize        # gamma, beta, mean, std blocks
        pipelined = 2 * (x_blk + y_blk + small)   # double-buffered by Pallas
        body_f32 = 2 * nb_ * c * t_ * 4           # x_f32 + diff live in the body
        return pipelined + body_f32

    while t > 128 and footprint(nb, t) > vmem_budget:
        t -= 128
    while nb > 1 and footprint(nb, t) > vmem_budget:
        nb -= 1

    # Feed both v7x TensorCores: make sure the grid has >= 2 points if possible.
    if pl.cdiv(n, nb) * pl.cdiv(hw, t) < 2:
        if nb > 1:
            nb = max(1, nb // 2)
        elif t > 128:
            t = max(128, _round_up(pl.cdiv(hw, 2), 128))

    return nb, t


def pono(x, gamma, beta, eps=1e-5):
    """x: (N, C, H, W) ; gamma/beta: (1, 1, H, W). Returns (y, mean, std)."""
    n, c, h, w = x.shape
    assert gamma.shape == (1, 1, h, w), f"gamma shape {gamma.shape} != (1,1,{h},{w})"
    assert beta.shape == (1, 1, h, w), f"beta shape {beta.shape} != (1,1,{h},{w})"
    hw = h * w
    x3 = x.reshape(n, c, hw)
    g3 = gamma.reshape(1, 1, hw)
    b3 = beta.reshape(1, 1, hw)
    dsize = jnp.dtype(x.dtype).itemsize

    # VMEM budget: v7x has 64 MiB physical, v5e/v6e 128 MiB. Use 3/4 of it as
    # the scoped limit and half of that as the tile-selection budget
    # (headroom for Mosaic scratch / pipeline bookkeeping).
    try:
        info = pltpu.get_tpu_info()
        vmem_cap = int(getattr(info, "vmem_capacity_bytes", 64 << 20))
    except Exception:  # pragma: no cover - conservative fallback
        vmem_cap = 64 << 20
    vmem_limit = min(vmem_cap * 3 // 4, 96 << 20)
    vmem_budget = vmem_limit // 2

    nb, t = _select_tiles(n, c, hw, dsize, vmem_budget)
    n_tiles = pl.cdiv(n, nb)
    hw_tiles = pl.cdiv(hw, t)

    # Unbiased variance reciprocal; C == 1 -> NaN exactly like torch.
    inv_cm1 = 1.0 / (c - 1) if c > 1 else float("nan")
    kernel = functools.partial(_pono_kernel, eps=float(eps), inv_cm1=inv_cm1)

    cost = pl.CostEstimate(
        flops=7 * n * c * hw,
        transcendentals=2 * n * hw,
        # x read + y write + mean/std writes + gamma/beta read once
        bytes_accessed=(2 * n * c * hw + 2 * n * hw + 2 * hw) * dsize,
    )

    y3, m3, s3 = pl.pallas_call(
        kernel,
        out_shape=(
            jax.ShapeDtypeStruct((n, c, hw), x.dtype),
            jax.ShapeDtypeStruct((n, 1, hw), x.dtype),
            jax.ShapeDtypeStruct((n, 1, hw), x.dtype),
        ),
        grid_spec=pltpu.PrefetchScalarGridSpec(
            num_scalar_prefetch=0,
            # HW outermost, batch innermost: gamma/beta block index (0,0,j) is
            # constant across the inner loop, so Pallas skips re-fetching them.
            grid=(hw_tiles, n_tiles),
            in_specs=[
                pl.BlockSpec((nb, c, t), lambda j, i: (i, 0, j)),
                pl.BlockSpec((1, 1, t), lambda j, i: (0, 0, j)),
                pl.BlockSpec((1, 1, t), lambda j, i: (0, 0, j)),
            ],
            out_specs=[
                pl.BlockSpec((nb, c, t), lambda j, i: (i, 0, j)),
                pl.BlockSpec((nb, 1, t), lambda j, i: (i, 0, j)),
                pl.BlockSpec((nb, 1, t), lambda j, i: (i, 0, j)),
            ],
        ),
        compiler_params=pltpu.CompilerParams(
            dimension_semantics=("parallel", "parallel"),
            vmem_limit_bytes=int(vmem_limit),
        ),
        cost_estimate=cost,
    )(x3, g3, b3)

    return (
        y3.reshape(n, c, h, w),
        m3.reshape(n, 1, h, w),
        s3.reshape(n, 1, h, w),
    )


def _reference_pono(x, gamma, beta, eps=1e-5):
    mean = jnp.mean(x, axis=1, keepdims=True)
    var = jnp.var(x, axis=1, keepdims=True, ddof=1)  # unbiased, like torch default
    std = jnp.sqrt(var + eps)
    y = (x - mean) / std
    y = y * gamma + beta
    return y, mean, std


if __name__ == "__main__":
    key = jax.random.PRNGKey(0)
    N, C, H, W = 2, 4, 16, 16

    x = jax.random.normal(key, (N, C, H, W), dtype=jnp.float32)

    # Deterministic parameter init matching PONO.__init__(input_size=(H, W)):
    #   beta  = zeros(1, 1, H, W), gamma = ones(1, 1, H, W)
    beta = jnp.zeros((1, 1, H, W), dtype=jnp.float32)
    gamma = jnp.ones((1, 1, H, W), dtype=jnp.float32)

    y, mean, std = pono(x, gamma, beta, eps=1e-5)
    jax.block_until_ready((y, mean, std))

    y_ref, m_ref, s_ref = _reference_pono(x, gamma, beta, eps=1e-5)
    assert jnp.allclose(y, y_ref, atol=1e-5, rtol=1e-5)
    assert jnp.allclose(mean, m_ref, atol=1e-6, rtol=1e-6)
    assert jnp.allclose(std, s_ref, atol=1e-6, rtol=1e-6)

    print("KERNEL_OK")
</pallas_src>

<mosaic_0001>
module attributes {stable_mosaic.version = 11 : i64} {
  func.func @_pono_kernel(%arg0: i32, %arg1: i32, %arg2: memref<1x4x256xf32, #tpu.memory_space<vmem>>, %arg3: memref<1x1x256xf32, #tpu.memory_space<vmem>>, %arg4: memref<1x1x256xf32, #tpu.memory_space<vmem>>, %arg5: memref<1x4x256xf32, #tpu.memory_space<vmem>>, %arg6: memref<1x1x256xf32, #tpu.memory_space<vmem>>, %arg7: memref<1x1x256xf32, #tpu.memory_space<vmem>>) attributes {dimension_semantics = [#tpu.dimension_semantics<parallel>, #tpu.dimension_semantics<parallel>], iteration_bounds = array<i64: 1, 2>, scalar_prefetch = 0 : i64, scratch_operands = 0 : i64, tpu.core_type = #tpu.core_type<tc>, window_params = [{transform_indices = @transform_0, window_bounds = array<i64: 1, 4, 256>}, {transform_indices = @transform_1, window_bounds = array<i64: 1, 1, 256>}, {transform_indices = @transform_2, window_bounds = array<i64: 1, 1, 256>}, {transform_indices = @transform_3, window_bounds = array<i64: 1, 4, 256>}, {transform_indices = @transform_4, window_bounds = array<i64: 1, 1, 256>}, {transform_indices = @transform_5, window_bounds = array<i64: 1, 1, 256>}]} {
    %c0 = arith.constant 0 : index
    %c0_0 = arith.constant 0 : index
    %c0_1 = arith.constant 0 : index
    %0 = vector.load %arg2[%c0, %c0_0, %c0_1] : memref<1x4x256xf32, #tpu.memory_space<vmem>>, vector<1x4x256xf32>
    %cst = arith.constant dense<0.000000e+00> : vector<1x256xf32>
    %1 = vector.multi_reduction <add>, %0, %cst [1] : vector<1x4x256xf32> to vector<1x256xf32>
    %2 = vector.shape_cast %1 : vector<1x256xf32> to vector<1x1x256xf32>
    %cst_2 = arith.constant 4.000000e+00 : f32
    %3 = vector.broadcast %cst_2 : f32 to vector<1x1x256xf32>
    %4 = arith.divf %2, %3 : vector<1x1x256xf32>
    %5 = vector.broadcast %4 : vector<1x1x256xf32> to vector<1x4x256xf32>
    %6 = arith.subf %0, %5 : vector<1x4x256xf32>
    %7 = arith.mulf %6, %6 : vector<1x4x256xf32>
    %cst_3 = arith.constant dense<0.000000e+00> : vector<1x256xf32>
    %8 = vector.multi_reduction <add>, %7, %cst_3 [1] : vector<1x4x256xf32> to vector<1x256xf32>
    %9 = vector.shape_cast %8 : vector<1x256xf32> to vector<1x1x256xf32>
    %cst_4 = arith.constant 0.333333343 : f32
    %10 = vector.broadcast %cst_4 : f32 to vector<1x1x256xf32>
    %11 = arith.mulf %9, %10 : vector<1x1x256xf32>
    %cst_5 = arith.constant 9.99999974E-6 : f32
    %12 = vector.broadcast %cst_5 : f32 to vector<1x1x256xf32>
    %13 = arith.addf %11, %12 : vector<1x1x256xf32>
    %14 = math.rsqrt %13 : vector<1x1x256xf32>
    %15 = math.sqrt %13 : vector<1x1x256xf32>
    %c0_6 = arith.constant 0 : index
    %c0_7 = arith.constant 0 : index
    %c0_8 = arith.constant 0 : index
    %16 = vector.load %arg3[%c0_6, %c0_7, %c0_8] : memref<1x1x256xf32, #tpu.memory_space<vmem>>, vector<1x1x256xf32>
    %17 = arith.mulf %14, %16 : vector<1x1x256xf32>
    %18 = vector.broadcast %17 : vector<1x1x256xf32> to vector<1x4x256xf32>
    %19 = arith.mulf %6, %18 : vector<1x4x256xf32>
    %c0_9 = arith.constant 0 : index
    %c0_10 = arith.constant 0 : index
    %c0_11 = arith.constant 0 : index
    %20 = vector.load %arg4[%c0_9, %c0_10, %c0_11] : memref<1x1x256xf32, #tpu.memory_space<vmem>>, vector<1x1x256xf32>
    %21 = vector.broadcast %20 : vector<1x1x256xf32> to vector<1x4x256xf32>
    %22 = arith.addf %19, %21 : vector<1x4x256xf32>
    %c0_12 = arith.constant 0 : index
    %c0_13 = arith.constant 0 : index
    %c0_14 = arith.constant 0 : index
    %23 = vector.load %arg5[%c0_12, %c0_13, %c0_14] : memref<1x4x256xf32, #tpu.memory_space<vmem>>, vector<1x4x256xf32>
    tpu.vector_store %arg5[%c0_12, %c0_13, %c0_14], %22 {strides = array<i32>} : memref<1x4x256xf32, #tpu.memory_space<vmem>>, vector<1x4x256xf32>,
    %c0_15 = arith.constant 0 : index
    %c0_16 = arith.constant 0 : index
    %c0_17 = arith.constant 0 : index
    %24 = vector.load %arg6[%c0_15, %c0_16, %c0_17] : memref<1x1x256xf32, #tpu.memory_space<vmem>>, vector<1x1x256xf32>
    tpu.vector_store %arg6[%c0_15, %c0_16, %c0_17], %4 {strides = array<i32>} : memref<1x1x256xf32, #tpu.memory_space<vmem>>, vector<1x1x256xf32>,
    %c0_18 = arith.constant 0 : index
    %c0_19 = arith.constant 0 : index
    %c0_20 = arith.constant 0 : index
    %25 = vector.load %arg7[%c0_18, %c0_19, %c0_20] : memref<1x1x256xf32, #tpu.memory_space<vmem>>, vector<1x1x256xf32>
    tpu.vector_store %arg7[%c0_18, %c0_19, %c0_20], %15 {strides = array<i32>} : memref<1x1x256xf32, #tpu.memory_space<vmem>>, vector<1x1x256xf32>,
    return
  }
  func.func @transform_0(%arg0: i32, %arg1: i32) -> (i32, i32, i32) {
    %c0_i32 = arith.constant 0 : i32
    %c0_i32_0 = arith.constant 0 : i32
    return %arg1, %c0_i32, %arg0 : i32, i32, i32
  }
  func.func @transform_1(%arg0: i32, %arg1: i32) -> (i32, i32, i32) {
    %c0_i32 = arith.constant 0 : i32
    %c0_i32_0 = arith.constant 0 : i32
    %c0_i32_1 = arith.constant 0 : i32
    return %c0_i32, %c0_i32_0, %arg0 : i32, i32, i32
  }
  func.func @transform_2(%arg0: i32, %arg1: i32) -> (i32, i32, i32) {
    %c0_i32 = arith.constant 0 : i32
    %c0_i32_0 = arith.constant 0 : i32
    %c0_i32_1 = arith.constant 0 : i32
    return %c0_i32, %c0_i32_0, %arg0 : i32, i32, i32
  }
  func.func @transform_3(%arg0: i32, %arg1: i32) -> (i32, i32, i32) {
    %c0_i32 = arith.constant 0 : i32
    %c0_i32_0 = arith.constant 0 : i32
    return %arg1, %c0_i32, %arg0 : i32, i32, i32
  }
  func.func @transform_4(%arg0: i32, %arg1: i32) -> (i32, i32, i32) {
    %c0_i32 = arith.constant 0 : i32
    %c0_i32_0 = arith.constant 0 : i32
    return %arg1, %c0_i32, %arg0 : i32, i32, i32
  }
  func.func @transform_5(%arg0: i32, %arg1: i32) -> (i32, i32, i32) {
    %c0_i32 = arith.constant 0 : i32
    %c0_i32_0 = arith.constant 0 : i32
    return %arg1, %c0_i32, %arg0 : i32, i32, i32
  }
}

</mosaic_0001>

<bundles_post_ra>
// kernel: tpu_custom_call.1
= control target key start
LH: loop header
LB: loop body
LE: loop exit
PB: predicated region body
PF: predicated region fallthrough
CT: control target
= control target key end

     0   :  { %11 = vsyncpa [#allocation3], 0  ;;  %s1327_s0 = inlined_call_operand.hbm [shape: f32[2,4,256], index: 0, kind: input, shape index: {}]   ;;  %s1328_s1 = inlined_call_operand.hbm [shape: f32[1,1,256], index: 1, kind: input, shape index: {}]   ;;  %s1329_s2 = inlined_call_operand.hbm [shape: f32[1,1,256], index: 2, kind: input, shape index: {}]   ;;  %s1330_s3 = inlined_call_operand.hbm [shape: f32[2,4,256], index: 3, kind: output, shape index: {0}]   ;;  %s1331_s4 = inlined_call_operand.hbm [shape: f32[2,1,256], index: 4, kind: output, shape index: {1}]   ;;  %s1332_s5 = inlined_call_operand.hbm [shape: f32[2,1,256], index: 5, kind: output, shape index: {2}]  }
   0x1   :  { %13 = vsyncpa [#allocation3 + $0x1], 0 }
   0x2   :  { %14 = vsyncpa [#allocation6], 0 }
   0x3   :  { %15 = vsyncpa [#allocation4], 0 }
   0x4   :  { %17 = vsyncpa [#allocation4 + $0x1], 0 }
   0x5   :  { %18 = vsyncpa [#allocation10], 0 }
   0x6   :  { %20 = vsyncpa [#allocation10 + $0x1], 0  ;;  %s1111_s18 = smov 0   ;;  %s1113_s19 = smov 0  }
   0x7   :  { %s1115_s20 = smov 0   ;;  %s1117_s21 = smov 0  }
   0x8   :  { %s1119_s22 = smov 0   ;;  %s1121_s23 = smov 0  }
   0x9 LB: > { %s1142_s24 = sadd.s32 4294967295, %s1076_s23   ;;  %s1333_s25 = sadd.s32 4294967294, %s1076_s23   ;;  %s1076_s23 = sphi %s1121_s23, %s26_s23   ;;  %s1072_s22 = sphi %s1119_s22, %s1347_s22   ;;  %s1068_s21 = sphi %s1117_s21, %s1346_s21   ;;  %s1064_s20 = sphi %s1115_s20, %s1345_s20   ;;  %s1060_s19 = sphi %s1113_s19, %s1344_s19   ;;  %s1056_s18 = sphi %s1111_s18, %s1343_s18  }
   0xa   : > { %p60_p0 = scmp.ne.s32.totalorder %s1060_s19, %s1056_s18  ;;  %p61_p1 = scmp.eq.s32.totalorder %s1142_s24, 0 }
   0xb   : > { %p144_p2 = scmp.eq.s32.totalorder %s1333_s25, 1  ;;  %p715_p4 = scmp.ge.s32.totalorder %s1076_s23, 1 }
   0xc   : > { %p1152_p3 = por %p61_p1, %p60_p0  ;;  %p207_p6 = scmp.lt.s32.totalorder %s1076_s23, 3 }
   0xd   : > { %p1157_p5 = por %p144_p2, %p60_p0  ;;  %s221_s30 = sshll.u32 %s1328_s1, 4  ;;  %s222_s30 = int_to_ptr.hbm [resolvable:$true] %s221_s30 }
   0xe   : > { %p1165_p7 = pnand %p715_p4, %p207_p6  ;;  %p718_p8 = scmp.ge.s32.totalorder %s1076_s23, 2 }
   0xf   : > { %s1078_s7 = smov [#allocation5]   ;;  %s235_s11 = sshll.u32 %s1329_s2, 4  ;;  %s236_s11 = int_to_ptr.hbm [resolvable:$true] %s235_s11 }
  0x10   : > { %p756_p9 = pneg %p1165_p7  ;;  %s223_s8 = sshll.u32 %s1078_s7, 4  ;;  %s224_s8 = int_to_ptr.vmem [resolvable:$true] %s223_s8 }
  0x11   : > { %s1079_s12 = smov [#allocation7]   ;;  %p138_p11 = scmp.eq.s32.totalorder %s1142_s24, 1 }
  0x12   : > { %p757_p10 = pnand %p756_p9, %p61_p1  ;;  %s237_s13 = sshll.u32 %s1079_s12, 4  ;;  %s238_s13 = int_to_ptr.vmem [resolvable:$true] %s237_s13 }
  0x13   : > { %s35_s14 = sadd.s32 1, %s1072_s22  ;;  %s47_s15 = sadd.s32 1, %s1064_s20 }
  0x14   : > { %759 = dma.hbm_to_vmem [thread:$0]  (!%p757_p10), %s222_s30, 32, %s224_s8, [#allocation6]  }
  0x15   : > { %762 = dma.hbm_to_vmem [thread:$0]  (!%p757_p10), %s236_s11, 32, %s238_s13, [#allocation6]  }
  0x16   : > { %p36_p12 = scmp.ge.s32.totalorder %s35_s14, 2  ;;  %p54_p13 = scmp.ne.s32.totalorder %s1064_s20, %s1060_s19 }
  0x17   : > { %p55_p0 = scmp.eq.s32.totalorder %s1076_s23, 0  ;;  %p779_p4 = scmp.lt.s32.totalorder %s1076_s23, 2 }
  0x18   : > { %s1349_s14 = smov (%p36_p12, %s35_s14), 0  ;;  %p1185_p2 = por %p138_p11, %p54_p13 }
  0x19   : > { %s42_s17 = ssub.s32 %s1072_s22, %s1349_s14  ;;  %s248_s28 = sand.u32 1, %s1064_s20  }
  0x1a   : > { %p45_p6 = scmp.eq.s32.totalorder %s42_s17, 0  ;;  %p56_p9 = por %p55_p0, %p54_p13 }
  0x1b   : > { %s719_s29 = sshll.u32 %s248_s28, 3  ;;  %s738_s30 = sshll.u32 %s1072_s22, 3 }
  0x1c   : > { %s1195_s7 = scalar_select %p45_p6, %s1064_s20, %s47_s15  }
  0x1d   : > { %s259_s10 = scalar_lea.hbm %s1327_s0, %s738_s30  ;;  %s252_s12 = scalar_lea.vmem [#allocation2], %s719_s29 }
  0x1e   : > { %s261_s11 = sshll.u32 %s259_s10, 4  ;;  %s263_s13 = sshll.u32 %s252_s12, 4  ;;  %s262_s11 = int_to_ptr.hbm [resolvable:$true] %s261_s11  ;;  %s264_s13 = int_to_ptr.vmem [resolvable:$true] %s263_s13 }
  0x1f   : > { %p764_p10 = pnand %p779_p4, %p56_p9  ;;  %s249_s25 = scalar_lea.sflag [#allocation3], %s248_s28 }
  0x20   : > { %272 = sbr.rel (%p1165_p7) target bundleno = 138 (0x8a), region = 32  ;;  %s1205_s15 = sand.u32 (!%p1165_p7), 1, %s1060_s19  }
  0x21   : > { %766 = dma.hbm_to_vmem [thread:$0]  (!%p764_p10), %s262_s11, 128, %s264_s13, %s249_s25  }
  0x22   : > { %s1334_s17 = sshll.u32 (!%p1165_p7), %s1205_s15, 3  ;;  %s275_s30 = scalar_lea.sflag (!%p1165_p7), [#allocation3], %s1205_s15 }
  0x23   : > { %s278_s29 = scalar_lea.vmem (!%p1165_p7), [#allocation2], %s1334_s17 }
  0x25   : > { %1039 = dma.done.wait (%p1152_p3), %s275_s30, 128  }
  0x26   : > { %1041 = vsyncadd (%p1152_p3), %s275_s30, 4294967168 }
  0x27   : > { %1043 = dma.done.wait (%p61_p1), [#allocation6], 64  }
  0x28   : > { %1045 = vsyncadd (%p61_p1), [#allocation6], 4294967232  ;;  %v1080_v0 = vmov 4.0   ;;  %v332_v2 = vld [vmem:[%s278_s29] sm:$0xff]  ;;  %vm339_vm0 = vcmask 1043456   ;;  %s734_s25 = sshll.u32 %s1068_s21, 1  ;;  %v467_v24 = vlaneseq }
  0x29   : > { %834 = vrcp.f32 %v1080_v0  ;;  %334 = vst [vmem:[#allocation1] ss:$2 sm:$0xff] %v332_v2  ;;  %s727_s26 = sshll.u32 %s1205_s15, 1  ;;  %s518_s8 = scalar_lea.hbm %s1331_s4, %s734_s25  ;;  %vm464_vm2 = vcmask 1040384  }
  0x2a   : > { %s318_s9 = scalar_lea.vmem [#allocation9], %s727_s26  ;;  %s483_s11 = sand.u32 1, %s1142_s24   ;;  %vm1231_vm3 = vcmp.lt.s32.totalorder %v467_v24, 256 }
  0x2b   : > { %s520_s10 = sshll.u32 %s318_s9, 4  ;;  %s522_s12 = sshll.u32 %s518_s8, 4  ;;  %s521_s10 = int_to_ptr.vmem [resolvable:$true] %s520_s10  ;;  %s523_s12 = int_to_ptr.hbm [resolvable:$true] %s522_s12 }
  0x2c   : > { %s1241_s24 = scalar_lea.sflag [#allocation10], %s483_s11  ;;  %s944_s13 = sshra.s32 %s523_s12, 4  ;;  %s945_s13 = int_to_ptr.hbm [resolvable:$true] %s944_s13 }
  0x2d   : > { %s946_s30 = scalar_lea.hbm %s945_s13, 2  ;;  %s950_s28 = scalar_lea.hbm %s1331_s4, 4 }
  0x2e   : > { %p947_p1 = scmp.ne.s32.totalorder %s945_s13, %s946_s30  ;;  %p951_p11 = scmp.lt.s32.totalorder %s945_s13, %s1331_s4 }
  0x2f   : > { %v835_v1 = vpop.eup %834  ;;  %p952_p12 = scmp.lt.s32.totalorder %s950_s28, %s946_s30 }
  0x30   : > { %v355_v3 = vmul.f32 4.0, %v835_v1  ;;  %v335_v5 = vld.sshfl [vmem:[#allocation1] sm:$0xff pattern:$0x75316420]  ;;  %vm359_vm1 = vweird.f32 %v835_v1  ;;  %p948_p3 = pnand %p947_p1, %p1185_p2 }
  0x31   : > { %v336_v6 = vld.sshfl [vmem:[#allocation1 + $0x8] sm:$0xff pattern:$0x75316420]  ;;  %v340_v7 = vsel %vm339_vm0, %v335_v5, 0.0  ;;  %p953_p13 = por %p952_p12, %p951_p11 }
  0x32   : > { %v356_v4 = vsub.f32 1.0, %v355_v3  ;;  %v347_v8 = vsel %vm339_vm0, %v336_v6, 0.0  ;;  %v341_v9 = vrot.slane %v340_v7, 4  ;;  %p949_p7 = pneg %p948_p3 }
  0x33   : > { %v348_v10 = vrot.slane %v347_v8, 4 }
  0x34   : > { %v357_v11 = vmul.f32 %v835_v1, %v356_v4  ;;  %v342_v12 = vadd.f32 %v341_v9, %v340_v7  ;;  %p954_p0 = pnand %p953_p13, %p949_p7 }
  0x35   : > { %v349_v13 = vadd.f32 %v348_v10, %v347_v8 }
  0x36   : > { %v343_v14 = vrot.slane %v342_v12, 2  ;;  %v358_v16 = vadd.f32 %v835_v1, %v357_v11 }
  0x37   : > { %v350_v15 = vrot.slane %v349_v13, 2 }
  0x38   : > { %v344_v17 = vadd.f32 %v343_v14, %v342_v12  ;;  %v360_v21 = vsel %vm359_vm1, %v835_v1, %v358_v16 }
  0x39   : > { %v351_v18 = vadd.f32 %v350_v15, %v349_v13 }
  0x3a   : > { %v345_v19 = vrot.slane %v344_v17, 1 }
  0x3b   : > { %v352_v20 = vrot.slane %v351_v18, 1 }
  0x3c   : > { %v346_v22 = vadd.f32 %v345_v19, %v344_v17 }
  0x3d   : > { %v353_v23 = vadd.f32 %v352_v20, %v351_v18 }
  0x3e   : > { %v361_v26 = vmul.f32 %v360_v21, %v346_v22 }
  0x3f   : > { %v362_v25 = vmul.f32 %v360_v21, %v353_v23 }
  0x41   : > { %v365_v27 = vrot.slane %v362_v25, 4  ;;  %v463_v28 = vrot.slane %v362_v25, 7 }
  0x43   : > { %v366_v30 = vsel %vm339_vm0, %v361_v26, %v365_v27  ;;  %v465_v31 = vsel %vm464_vm2, %v361_v26, %v463_v28 }
  0x44   : > { %v1237_v32 = vsub.f32 %v332_v2, %v366_v30  ;;  %471 = vst.msk [vmem:[%s318_s9] sm:$0x3] %vm1231_vm3, %v465_v31 }
  0x45   : > { %957 = shalt.err (!%p954_p0)
}
  0x46   : > { %751 = dma.vmem_to_hbm [thread:$0]  (%p1185_p2), %s521_s10, 32, %s523_s12, %s1241_s24   ;;  %v369_v33 = vmul.f32 %v1237_v32, %v1237_v32  ;;  %v438_v62 = vld [vmem:[#allocation5] sm:$0x3]  ;;  %v454_v1 = vld [vmem:[#allocation7] sm:$0x3] }
  0x47   : > { %v440_v3 = vperm.slane %v438_v62, 0  ;;  %v441_v4 = vperm.slane %v438_v62, 1  ;;  %v457_v8 = vperm.slane %v454_v1, 1  ;;  %s534_s10 = scalar_lea.hbm %s1332_s5, %s734_s25  ;;  %s739_s11 = sshll.u32 %s1068_s21, 3  ;;  %v456_v16 = vperm.slane %v454_v1, 0 }
  0x48   : > { %371 = vst [vmem:[#allocation1] ss:$2 sm:$0xff] %v369_v33  ;;  %s325_s12 = scalar_lea.vmem [#allocation11], %s727_s26  ;;  %s538_s30 = sshll.u32 %s534_s10, 4  ;;  %s539_s30 = int_to_ptr.hbm [resolvable:$true] %s538_s30 }
  0x49   : > { %s536_s13 = sshll.u32 %s325_s12, 4  ;;  %v458_v20 = vrot.slane %v457_v8, 4  ;;  %s1269_s6 = scalar_lea.hbm %s1330_s3, %s739_s11  ;;  %s537_s13 = int_to_ptr.vmem [resolvable:$true] %s536_s13 }
  0x4a   : > { %s1341_s21 = sshll.u32 %s1205_s15, 3  ;;  %s506_s8 = sshll.u32 %s1269_s6, 4  ;;  %s507_s8 = int_to_ptr.hbm [resolvable:$true] %s506_s8 }
  0x4b   : > { %s311_s26 = scalar_lea.vmem [#allocation8], %s1341_s21  ;;  %v459_v27 = vsel %vm339_vm0, %v456_v16, %v458_v20  ;;  %s972_s17 = sshra.s32 %s539_s30, 4  ;;  %s973_s17 = int_to_ptr.hbm [resolvable:$true] %s972_s17 }
  0x4c   : > { %s504_s28 = sshll.u32 %s311_s26, 4  ;;  %s974_s9 = scalar_lea.hbm %s973_s17, 2  ;;  %s505_s28 = int_to_ptr.vmem [resolvable:$true] %s504_s28 }
  0x4d   : > { %p975_p4 = scmp.ne.s32.totalorder %s973_s17, %s974_s9  ;;  %s978_s25 = scalar_lea.hbm %s1332_s5, 4 }
  0x4e   : > { %p979_p10 = scmp.lt.s32.totalorder %s973_s17, %s1332_s5  ;;  %p980_p1 = scmp.lt.s32.totalorder %s978_s25, %s974_s9 }
  0x4f   : > { %v372_v34 = vld.sshfl [vmem:[#allocation1] sm:$0xff pattern:$0x75316420]  ;;  %v373_v35 = vld.sshfl [vmem:[#allocation1 + $0x8] sm:$0xff pattern:$0x75316420]  ;;  %p976_p6 = pnand %p975_p4, %p1185_p2 }
  0x50   : > { %v376_v36 = vsel %vm339_vm0, %v372_v34, 0.0  ;;  %v383_v37 = vsel %vm339_vm0, %v373_v35, 0.0  ;;  %p981_p3 = por %p980_p1, %p979_p10 }
  0x51   : > { %v377_v38 = vrot.slane %v376_v36, 4  ;;  %v384_v39 = vrot.slane %v383_v37, 4  ;;  %p977_p9 = pneg %p976_p6 }
  0x53   : > { %v378_v40 = vadd.f32 %v377_v38, %v376_v36  ;;  %v385_v41 = vadd.f32 %v384_v39, %v383_v37  ;;  %p982_p7 = pnand %p981_p3, %p977_p9 }
  0x55   : > { %v379_v42 = vrot.slane %v378_v40, 2  ;;  %v386_v43 = vrot.slane %v385_v41, 2 }
  0x57   : > { %v380_v44 = vadd.f32 %v379_v42, %v378_v40  ;;  %v387_v45 = vadd.f32 %v386_v43, %v385_v41 }
  0x59   : > { %v381_v46 = vrot.slane %v380_v44, 1  ;;  %v388_v47 = vrot.slane %v387_v45, 1 }
  0x5b   : > { %v382_v48 = vadd.f32 %v381_v46, %v380_v44  ;;  %v389_v49 = vadd.f32 %v388_v47, %v387_v45 }
  0x5d   : > { %v390_v50 = vmul.f32 0.33333334, %v382_v48  ;;  %v391_v51 = vmul.f32 0.33333334, %v389_v49 }
  0x5f   : > { %v392_v52 = vadd.f32 1e-05, %v390_v50  ;;  %v393_v53 = vadd.f32 1e-05, %v391_v51 }
  0x61   : > { %836 = vrsqrt.f32 %v392_v52  ;;  %vm400_vm6 = vweird.f32 %v392_v52  ;;  %vm410_vm8 = vweird.f32 %v393_v53  ;;  %vm421_vm10 = vcmp.eq.f32.partialorder %v392_v52, inf }
  0x62   : > { %838 = vrsqrt.f32 %v393_v53  ;;  %vm433_vm11 = vcmp.eq.f32.partialorder %v393_v53, inf  ;;  %v436_v11 = vand.u32 2147483648, %v393_v53  ;;  %vm435_vm12 = vcmp.eq.f32.partialorder %v393_v53, 0.0 }
  0x63   : > { %v424_v17 = vand.u32 2147483648, %v392_v52  ;;  %vm423_vm13 = vcmp.eq.f32.partialorder %v392_v52, 0.0 }
  0x67   : > { %v837_v54 = vpop.eup %836 }
  0x68   : > { %v839_v55 = vpop.eup %838  ;;  %v395_v56 = vmul.f32 %v837_v54, %v392_v52  ;;  %vm401_vm4 = vweird.f32 %v837_v54 }
  0x69   : > { %v405_v57 = vmul.f32 %v839_v55, %v393_v53  ;;  %vm411_vm5 = vweird.f32 %v839_v55  ;;  %vm402_vm7 = vmor %vm400_vm6, %vm401_vm4 }
  0x6a   : > { %v396_v58 = vmul.f32 %v837_v54, %v395_v56  ;;  %vm412_vm9 = vmor %vm410_vm8, %vm411_vm5 }
  0x6b   : > { %v406_v59 = vmul.f32 %v839_v55, %v405_v57 }
  0x6c   : > { %v397_v60 = vmul.f32 0.5, %v396_v58 }
  0x6d   : > { %v407_v61 = vmul.f32 0.5, %v406_v59 }
  0x6e   : > { %v398_v63 = vsub.f32 1.5, %v397_v60 }
  0x6f   : > { %v408_v0 = vsub.f32 1.5, %v407_v61 }
  0x70   : > { %v399_v2 = vmul.f32 %v837_v54, %v398_v63 }
  0x71   : > { %v409_v5 = vmul.f32 %v839_v55, %v408_v0 }
  0x72   : > { %v420_v6 = vmul.f32 %v399_v2, %v392_v52  ;;  %v403_v7 = vsel %vm402_vm7, %v837_v54, %v399_v2 }
  0x73   : > { %v432_v9 = vmul.f32 %v409_v5, %v393_v53  ;;  %v413_v10 = vsel %vm412_vm9, %v839_v55, %v409_v5  ;;  %v444_v12 = vmul.f32 %v440_v3, %v403_v7 }
  0x74   : > { %v445_v13 = vmul.f32 %v441_v4, %v413_v10  ;;  %v422_v14 = vsel %vm421_vm10, %v392_v52, %v420_v6 }
  0x75   : > { %v434_v15 = vsel %vm433_vm11, %v393_v53, %v432_v9  ;;  %v425_v22 = vsel %vm423_vm13, %v424_v17, %v422_v14  ;;  %v446_v23 = vperm.slane %v444_v12, 0 }
  0x76   : > { %v437_v18 = vsel %vm435_vm12, %v436_v11, %v434_v15  ;;  %v447_v19 = vperm.slane %v445_v13, 0 }
  0x77   : > { %v474_v21 = vrot.slane %v437_v18, 7 }
  0x78   : > { %v450_v24 = vrot.slane %v447_v19, 4 }
  0x79   : > { %v475_v25 = vsel %vm464_vm2, %v425_v22, %v474_v21 }
  0x7a   : > { %477 = vst.msk [vmem:[%s325_s12] sm:$0x3] %vm1231_vm3, %v475_v25  ;;  %v451_v26 = vsel %vm339_vm0, %v446_v23, %v450_v24 }
  0x7b   : > { %v453_v28 = vmul.f32 %v451_v26, %v1237_v32 }
  0x7c   : > { %985 = shalt.err (!%p982_p7)
}
  0x7d   : > { %752 = dma.vmem_to_hbm [thread:$0]  (%p1185_p2), %s537_s13, 32, %s539_s30, %s1241_s24   ;;  %v461_v29 = vadd.f32 %v459_v27, %v453_v28 }
  0x7e   : > { %s479_s6 = scalar_lea.sflag [#allocation4], %s1205_s15  ;;  %s1000_s21 = sshra.s32 %s507_s8, 4  ;;  %s1001_s21 = int_to_ptr.hbm [resolvable:$true] %s1000_s21 }
  0x7f   : > { %462 = vst [vmem:[%s311_s26] sm:$0xff] %v461_v29  ;;  %s1002_s10 = scalar_lea.hbm %s1001_s21, 8  ;;  %s1006_s11 = scalar_lea.hbm %s1330_s3, 16 }
  0x80   : > { %p1003_p11 = scmp.ne.s32.totalorder %s1001_s21, %s1002_s10  ;;  %p1007_p0 = scmp.lt.s32.totalorder %s1001_s21, %s1330_s3 }
  0x81   : > { %p1008_p4 = scmp.lt.s32.totalorder %s1006_s11, %s1002_s10 }
  0x82   : > { %p1004_p12 = pnand %p1003_p11, %p1185_p2 }
  0x83   : > { %p1009_p6 = por %p1008_p4, %p1007_p0 }
  0x84   : > { %p1005_p13 = pneg %p1004_p12 }
  0x86   : > { %p1010_p9 = pnand %p1009_p6, %p1005_p13 }
  0x88   : > { %1013 = shalt.err (!%p1010_p9)
}
  0x89   : > { %750 = dma.vmem_to_hbm [thread:$0]  (%p1185_p2), %s505_s28, 128, %s507_s8, %s479_s6  }
  0x8a PF: > { %s550_s15 = sand.u32 1, %s1056_s18   ;;  %p768_p10 = pnand %p718_p8, %p1157_p5 }
  0x8b   : > { %s551_s24 = scalar_lea.sflag [#allocation4], %s550_s15 }
  0x8c   : > { %p769_p1 = pneg %p768_p10 }
  0x8e   : > { %1047 = dma.done.wait (%p769_p1), %s551_s24, 128  }
  0x8f   : > { %1049 = vsyncadd (%p769_p1), %s551_s24, 4294967168  ;;  %s1342_s13 = sadd.s32 4294967294, %s1076_s23  }
  0x90   : > { %s560_s30 = sand.u32 1, %s1342_s13  }
  0x91   : > { %s561_s26 = scalar_lea.sflag [#allocation10], %s560_s30 }
  0x92   : > { %1051 = dma.done.wait (%p769_p1), %s561_s26, 64  }
  0x93   : > { %1053 = vsyncadd (%p769_p1), %s561_s26, 4294967232  ;;  %s26_s23 = sadd.s32 1, %s1076_s23   ;;  %s1343_s18 = smov %s1060_s19 }
  0x94   : > { %p23_p2 = scmp.ge.s32.totalorder %s26_s23, 4   ;;  %s1344_s19 = smov %s1064_s20 }
  0x95   : > { %s1345_s20 = smov %s1195_s7  ;;  %s1346_s21 = smov %s1072_s22 }
  0x96   : > { %s1347_s22 = smov %s1349_s14  ;;  %25 = sbr.rel (!%p23_p2) target bundleno = 9 (0x9), region = 119 }
  0x9b   :  { %577 = vsyncpa [#allocation3], 1 }
  0x9c   :  { %579 = vsyncpa [#allocation3 + $0x1], 1 }
  0x9d   :  { %580 = vsyncpa [#allocation6], 1 }
  0x9e   :  { %581 = vsyncpa [#allocation4], 1 }
  0x9f   :  { %583 = vsyncpa [#allocation4 + $0x1], 1 }
  0xa0   :  { %584 = vsyncpa [#allocation10], 1 }
  0xa1   :  { %586 = vsyncpa [#allocation10 + $0x1], 1 }

</bundles_post_ra>
